<compile_context>
chip_gen: v7x
topology: tpu7x:2x2x1
jax: 0.10.0
libtpu: 0.0.40
codegen_flags: <defaults>
</compile_context>

<pallas_src>
import functools
import math

import jax
import jax.numpy as jnp
from jax.experimental import pallas as pl
from jax.experimental.pallas import tpu as pltpu


def _gauss_1d(kernel_size: int, sigma: float):
    """Normalized 1-D Gaussian as Python floats (2-D kernel = outer product)."""
    if kernel_size % 2 == 0:
        raise ValueError("Kernel size must be odd.")
    half = kernel_size // 2
    g = [math.exp(-((i - half) ** 2) / (2.0 * sigma * sigma))
         for i in range(kernel_size)]
    s = sum(g)
    return tuple(v / s for v in g)


def _blur_kernel(x_ref, o_ref, xpad_ref, *, ksize: int, pad: int, w1d):
    # x_ref   : (1, H, W, CBLK)      input block  (VMEM), channels on lanes
    # o_ref   : (1, H, W, CBLK)      output block (VMEM)
    # xpad_ref: (H+2p, W+2p, CBLK)   f32 scratch holding one zero-padded plane
    H = o_ref.shape[1]
    W = o_ref.shape[2]
    CB = o_ref.shape[3]
    Hp = H + 2 * pad
    Wp = W + 2 * pad

    # --- Build the zero halo in VMEM: zero ONLY the border, then write the
    #     interior.  (Scratch is not zero-initialized; re-done every step so it
    #     is megacore-safe.)
    if pad > 0:
        zrow = jnp.zeros((pad, Wp, CB), jnp.float32)
        xpad_ref[0:pad, :, :] = zrow                       # top pad rows
        xpad_ref[pad + H:Hp, :, :] = zrow                  # bottom pad rows
        zcol = jnp.zeros((H, pad, CB), jnp.float32)
        xpad_ref[pad:pad + H, 0:pad, :] = zcol             # left pad cols
        xpad_ref[pad:pad + H, pad + W:Wp, :] = zcol        # right pad cols
    xpad_ref[pad:pad + H, pad:pad + W, :] = x_ref[0].astype(jnp.float32)

    # --- Vertical 1-D pass: taps are leading-dim ref slices (aligned loads,
    #     no padded-value round trip).
    acc_v = w1d[0] * xpad_ref[0:H, :, :]
    for i in range(1, ksize):
        acc_v = acc_v + w1d[i] * xpad_ref[i:i + H, :, :]   # (H, Wp, CBLK) f32

    # --- Horizontal 1-D pass: sublane offsets of the live value; lanes stay put.
    acc = w1d[0] * acc_v[:, 0:W, :]
    for j in range(1, ksize):
        acc = acc + w1d[j] * acc_v[:, j:j + W, :]          # (H, W, CBLK) f32

    o_ref[0] = acc.astype(o_ref.dtype)


def _per_step_bytes(cblk, H, W, pad, itemsize):
    """VMEM footprint of one grid step (incl. double buffering + f32 temps)."""
    Hp, Wp = H + 2 * pad, W + 2 * pad
    io = 2 * (H * W * cblk * itemsize) * 2          # in + out blocks, x2 buffers
    scratch = Hp * Wp * cblk * 4                    # f32 padded plane
    interm = (H * Wp * cblk + H * W * cblk) * 4     # acc_v + acc f32 values
    return io + scratch + interm


def _vmem_capacity_bytes():
    try:
        return int(pltpu.get_tpu_info().vmem_capacity_bytes)
    except Exception:
        return 64 * 1024 * 1024                     # conservative (v7x-sized)


def _pick_cblk(B, C, H, W, pad, itemsize, budget):
    """Largest legal channel block (128-multiple divisor of C, or C itself)
    fitting the VMEM budget; keeps >=2 grid steps when B == 1 if possible."""
    legal = [d for d in range(1, C + 1)
             if C % d == 0 and (d % 128 == 0 or d == C)]
    fitting = [d for d in legal
               if _per_step_bytes(d, H, W, pad, itemsize) <= budget]
    if not fitting:
        # TODO(synk): for very large H*W planes also tile H (with halo overlap)
        # instead of just shrinking the channel block.
        return min(legal)
    if B == 1:
        multi = [d for d in fitting if C // d >= 2]
        if multi:
            return max(multi)                        # keep both v7x TCs busy
    return max(fitting)


def gaussian_blur(x, kernel_size=3, sigma=1.0, cblk=None):
    """Depthwise Gaussian blur matching GaussianBlurLayer.forward (NCHW in/out)."""
    B, C, H, W = x.shape
    pad = kernel_size // 2
    w1d = _gauss_1d(kernel_size, sigma)

    vmem_cap = _vmem_capacity_bytes()
    budget = min(vmem_cap // 2, 48 * 1024 * 1024)    # generation-aware budget
    if cblk is None:
        cblk = _pick_cblk(B, C, H, W, pad, x.dtype.itemsize, budget)
    assert C % cblk == 0

    footprint = _per_step_bytes(cblk, H, W, pad, x.dtype.itemsize)
    vmem_limit = int(min(vmem_cap * 3 // 4,
                         max(32 * 1024 * 1024, footprint * 3 // 2)))

    kernel_fn = functools.partial(_blur_kernel, ksize=kernel_size, pad=pad,
                                  w1d=w1d)

    # Channels-last for the kernel: lanes carry channels, blur axes are
    # rows/sublanes (layout plumbing only; blur math is unchanged).
    x_t = jnp.transpose(x, (0, 2, 3, 1))             # (B, H, W, C)

    out_t = pl.pallas_call(
        kernel_fn,
        out_shape=jax.ShapeDtypeStruct((B, H, W, C), x.dtype),
        grid=(B, C // cblk),
        in_specs=[
            pl.BlockSpec((1, H, W, cblk), lambda b, c: (b, 0, 0, c)),
        ],
        out_specs=pl.BlockSpec((1, H, W, cblk), lambda b, c: (b, 0, 0, c)),
        scratch_shapes=[
            pltpu.VMEM((H + 2 * pad, W + 2 * pad, cblk), jnp.float32),
        ],
        compiler_params=pltpu.CompilerParams(
            dimension_semantics=("parallel", "parallel"),
            vmem_limit_bytes=vmem_limit,
        ),
    )(x_t)

    return jnp.transpose(out_t, (0, 3, 1, 2))        # back to NCHW


def _reference_blur(x, kernel_size=3, sigma=1.0):
    """Pure-JAX reference: depthwise conv2d identical to F.conv2d(groups=C)."""
    B, C, H, W = x.shape
    pad = kernel_size // 2
    ax = jnp.arange(kernel_size, dtype=jnp.float32) - kernel_size // 2
    xx, yy = jnp.meshgrid(ax, ax, indexing="ij")
    k2d = jnp.exp(-(xx ** 2 + yy ** 2) / (2.0 * sigma ** 2))
    k2d = k2d / jnp.sum(k2d)
    w = jnp.broadcast_to(k2d, (C, 1, kernel_size, kernel_size))  # OIHW, groups=C
    return jax.lax.conv_general_dilated(
        x, w,
        window_strides=(1, 1),
        padding=((pad, pad), (pad, pad)),
        dimension_numbers=("NCHW", "OIHW", "NCHW"),
        feature_group_count=C,
    )


if __name__ == "__main__":
    key = jax.random.PRNGKey(0)
    B, C, H, W = 2, 4, 16, 16
    x = jax.random.normal(key, (B, C, H, W), dtype=jnp.float32)

    out = gaussian_blur(x, kernel_size=3, sigma=1.0)
    out = jax.block_until_ready(out)

    ref = _reference_blur(x, kernel_size=3, sigma=1.0)
    assert out.shape == (B, C, H, W)
    assert jnp.allclose(out, ref, atol=1e-5, rtol=1e-5)

    print("KERNEL_OK")
</pallas_src>

<mosaic_0001>
module attributes {stable_mosaic.version = 11 : i64} {
  func.func @_blur_kernel(%arg0: i32, %arg1: i32, %arg2: memref<1x16x16x4xf32, #tpu.memory_space<vmem>>, %arg3: memref<1x16x16x4xf32, #tpu.memory_space<vmem>>, %arg4: memref<18x18x4xf32, #tpu.memory_space<vmem>>) attributes {dimension_semantics = [#tpu.dimension_semantics<parallel>, #tpu.dimension_semantics<parallel>], iteration_bounds = array<i64: 2, 1>, scalar_prefetch = 0 : i64, scratch_operands = 1 : i64, tpu.core_type = #tpu.core_type<tc>, window_params = [{transform_indices = @transform_0, window_bounds = array<i64: 1, 16, 16, 4>}, {transform_indices = @transform_1, window_bounds = array<i64: 1, 16, 16, 4>}]} {
    %cst = arith.constant 0.000000e+00 : f32
    %0 = vector.broadcast %cst : f32 to vector<1x18x4xf32>
    %c0 = arith.constant 0 : index
    %c0_0 = arith.constant 0 : index
    %c0_1 = arith.constant 0 : index
    %1 = vector.load %arg4[%c0, %c0_0, %c0_1] : memref<18x18x4xf32, #tpu.memory_space<vmem>>, vector<1x18x4xf32>
    tpu.vector_store %arg4[%c0, %c0_0, %c0_1], %0 {strides = array<i32>} : memref<18x18x4xf32, #tpu.memory_space<vmem>>, vector<1x18x4xf32>,
    %c17 = arith.constant 17 : index
    %c0_2 = arith.constant 0 : index
    %c0_3 = arith.constant 0 : index
    %2 = vector.load %arg4[%c17, %c0_2, %c0_3] : memref<18x18x4xf32, #tpu.memory_space<vmem>>, vector<1x18x4xf32>
    tpu.vector_store %arg4[%c17, %c0_2, %c0_3], %0 {strides = array<i32>} : memref<18x18x4xf32, #tpu.memory_space<vmem>>, vector<1x18x4xf32>,
    %cst_4 = arith.constant 0.000000e+00 : f32
    %3 = vector.broadcast %cst_4 : f32 to vector<16x1x4xf32>
    %c1 = arith.constant 1 : index
    %c0_5 = arith.constant 0 : index
    %c0_6 = arith.constant 0 : index
    %4 = vector.load %arg4[%c1, %c0_5, %c0_6] : memref<18x18x4xf32, #tpu.memory_space<vmem>>, vector<16x1x4xf32>
    tpu.vector_store %arg4[%c1, %c0_5, %c0_6], %3 {strides = array<i32>} : memref<18x18x4xf32, #tpu.memory_space<vmem>>, vector<16x1x4xf32>,
    %c1_7 = arith.constant 1 : index
    %c17_8 = arith.constant 17 : index
    %c0_9 = arith.constant 0 : index
    %5 = vector.load %arg4[%c1_7, %c17_8, %c0_9] : memref<18x18x4xf32, #tpu.memory_space<vmem>>, vector<16x1x4xf32>
    tpu.vector_store %arg4[%c1_7, %c17_8, %c0_9], %3 {strides = array<i32>} : memref<18x18x4xf32, #tpu.memory_space<vmem>>, vector<16x1x4xf32>,
    %c0_10 = arith.constant 0 : index
    %c0_11 = arith.constant 0 : index
    %c0_12 = arith.constant 0 : index
    %c0_13 = arith.constant 0 : index
    %6 = vector.load %arg2[%c0_10, %c0_11, %c0_12, %c0_13] : memref<1x16x16x4xf32, #tpu.memory_space<vmem>>, vector<1x16x16x4xf32>
    %7 = vector.shape_cast %6 : vector<1x16x16x4xf32> to vector<16x16x4xf32>
    %c1_14 = arith.constant 1 : index
    %c1_15 = arith.constant 1 : index
    %c0_16 = arith.constant 0 : index
    %8 = vector.load %arg4[%c1_14, %c1_15, %c0_16] : memref<18x18x4xf32, #tpu.memory_space<vmem>>, vector<16x16x4xf32>
    tpu.vector_store %arg4[%c1_14, %c1_15, %c0_16], %7 {strides = array<i32>} : memref<18x18x4xf32, #tpu.memory_space<vmem>>, vector<16x16x4xf32>,
    %c0_17 = arith.constant 0 : index
    %c0_18 = arith.constant 0 : index
    %c0_19 = arith.constant 0 : index
    %9 = vector.load %arg4[%c0_17, %c0_18, %c0_19] : memref<18x18x4xf32, #tpu.memory_space<vmem>>, vector<16x18x4xf32>
    %cst_20 = arith.constant 0.274068624 : f32
    %10 = vector.broadcast %cst_20 : f32 to vector<16x18x4xf32>
    %11 = arith.mulf %10, %9 : vector<16x18x4xf32>
    %c1_21 = arith.constant 1 : index
    %c0_22 = arith.constant 0 : index
    %c0_23 = arith.constant 0 : index
    %12 = vector.load %arg4[%c1_21, %c0_22, %c0_23] : memref<18x18x4xf32, #tpu.memory_space<vmem>>, vector<16x18x4xf32>
    %cst_24 = arith.constant 0.451862752 : f32
    %13 = vector.broadcast %cst_24 : f32 to vector<16x18x4xf32>
    %14 = arith.mulf %13, %12 : vector<16x18x4xf32>
    %15 = arith.addf %11, %14 : vector<16x18x4xf32>
    %c2 = arith.constant 2 : index
    %c0_25 = arith.constant 0 : index
    %c0_26 = arith.constant 0 : index
    %16 = vector.load %arg4[%c2, %c0_25, %c0_26] : memref<18x18x4xf32, #tpu.memory_space<vmem>>, vector<16x18x4xf32>
    %cst_27 = arith.constant 0.274068624 : f32
    %17 = vector.broadcast %cst_27 : f32 to vector<16x18x4xf32>
    %18 = arith.mulf %17, %16 : vector<16x18x4xf32>
    %19 = arith.addf %15, %18 : vector<16x18x4xf32>
    %20 = vector.extract_strided_slice %19 {offsets = [0, 0, 0], sizes = [16, 16, 4], strides = [1, 1, 1]} : vector<16x18x4xf32> to vector<16x16x4xf32>
    %cst_28 = arith.constant 0.274068624 : f32
    %21 = vector.broadcast %cst_28 : f32 to vector<16x16x4xf32>
    %22 = arith.mulf %21, %20 : vector<16x16x4xf32>
    %23 = vector.extract_strided_slice %19 {offsets = [0, 1, 0], sizes = [16, 16, 4], strides = [1, 1, 1]} : vector<16x18x4xf32> to vector<16x16x4xf32>
    %cst_29 = arith.constant 0.451862752 : f32
    %24 = vector.broadcast %cst_29 : f32 to vector<16x16x4xf32>
    %25 = arith.mulf %24, %23 : vector<16x16x4xf32>
    %26 = arith.addf %22, %25 : vector<16x16x4xf32>
    %27 = vector.extract_strided_slice %19 {offsets = [0, 2, 0], sizes = [16, 16, 4], strides = [1, 1, 1]} : vector<16x18x4xf32> to vector<16x16x4xf32>
    %cst_30 = arith.constant 0.274068624 : f32
    %28 = vector.broadcast %cst_30 : f32 to vector<16x16x4xf32>
    %29 = arith.mulf %28, %27 : vector<16x16x4xf32>
    %30 = arith.addf %26, %29 : vector<16x16x4xf32>
    %c0_31 = arith.constant 0 : index
    %c0_32 = arith.constant 0 : index
    %c0_33 = arith.constant 0 : index
    %c0_34 = arith.constant 0 : index
    %31 = vector.load %arg3[%c0_31, %c0_32, %c0_33, %c0_34] : memref<1x16x16x4xf32, #tpu.memory_space<vmem>>, vector<1x16x16x4xf32>
    %32 = vector.shape_cast %31 : vector<1x16x16x4xf32> to vector<16x16x4xf32>
    %33 = vector.shape_cast %30 : vector<16x16x4xf32> to vector<1x16x16x4xf32>
    tpu.vector_store %arg3[%c0_31, %c0_32, %c0_33, %c0_34], %33 {strides = array<i32>} : memref<1x16x16x4xf32, #tpu.memory_space<vmem>>, vector<1x16x16x4xf32>,
    return
  }
  func.func @transform_0(%arg0: i32, %arg1: i32) -> (i32, i32, i32, i32) {
    %c0_i32 = arith.constant 0 : i32
    %c0_i32_0 = arith.constant 0 : i32
    %c0_i32_1 = arith.constant 0 : i32
    return %arg0, %c0_i32, %c0_i32_0, %arg1 : i32, i32, i32, i32
  }
  func.func @transform_1(%arg0: i32, %arg1: i32) -> (i32, i32, i32, i32) {
    %c0_i32 = arith.constant 0 : i32
    %c0_i32_0 = arith.constant 0 : i32
    %c0_i32_1 = arith.constant 0 : i32
    return %arg0, %c0_i32, %c0_i32_0, %arg1 : i32, i32, i32, i32
  }
}

</mosaic_0001>

<bundles_post_ra>
// kernel: tpu_custom_call.1
= control target key start
LH: loop header
LB: loop body
LE: loop exit
PB: predicated region body
PF: predicated region fallthrough
CT: control target
= control target key end

     0   :  { %s1310_s6 = smov 0   ;;  %s1312_s7 = smov 0   ;;  %s1700_s0 = inlined_call_operand.vmem [shape: f32[2,16,16,4], index: 0, kind: input, shape index: {}]   ;;  %s1701_s1 = inlined_call_operand.vmem [shape: f32[2,16,16,4], index: 1, kind: output, shape index: {}]  }
   0x1   :  { %s1314_s8 = smov 0  }
   0x2 LB: > { %s23_s9 = sadd.s32 1, %s1293_s7  ;;  %p1241_p0 = scmp.ge.s32.totalorder %s1297_s8, 1  ;;  %s1297_s8 = sphi %s1314_s8, %s11_s8   ;;  %s1293_s7 = sphi %s1312_s7, %s1703_s7   ;;  %s1289_s6 = sphi %s1310_s6, %s1702_s6  }
   0x3   : > { %p25_p1 = scmp.ge.s32.totalorder %s23_s9, 2  ;;  %p106_p2 = scmp.lt.s32.totalorder %s1297_s8, 3 }
   0x5   : > { %s1705_s9 = smov (%p25_p1, %s23_s9), 0  ;;  %p107_p3 = pnand %p1241_p0, %p106_p2 }
   0x6   : > { %vm148_vm0 = vcmask (!%p107_p3), 31744   ;;  %vm151_vm1 = vcmask (!%p107_p3), 25600   ;;  %vm158_vm2 = vcmask (!%p107_p3), 24576   ;;  %p132_p4 = scmp.lt.s32.totalorder (!%p107_p3), %s1289_s6, 1  ;;  %v1299_v0 = vmov (!%p107_p3), 0.0  }
   0x7   : > { %110 = sbr.rel (%p107_p3) target bundleno = 181 (0xb5), region = 24  ;;  %149 = vst.msk [vmem:[#allocation2] sm:$0xff] (!%p107_p3), %vm148_vm0, %v1299_v0  ;;  %150 = vst.msk [vmem:[#allocation2 + $0x8] sm:$0xff] (!%p107_p3), %vm148_vm0, %v1299_v0  ;;  %vm768_vm3 = vcmask (!%p107_p3), 1046528   ;;  %vm977_vm4 = vcmask (!%p107_p3), 1045504  }
   0x8   : > { %154 = vst.msk [vmem:[#allocation2 + $0x198] sm:$0xff] (!%p107_p3), %vm148_vm0, %v1299_v0  ;;  %155 = vst.msk [vmem:[#allocation2 + $0x1a0] sm:$0xff] (!%p107_p3), %vm148_vm0, %v1299_v0 }
   0x9   : > { %152 = vst.msk [vmem:[#allocation2 + $0x10] sm:$0x3] (!%p107_p3), %vm151_vm1, %v1299_v0  ;;  %156 = vst.msk [vmem:[#allocation2 + $0x1a8] sm:$0x3] (!%p107_p3), %vm151_vm1, %v1299_v0 }
   0xa   : > { %159 = vst.msk [vmem:[#allocation2 + $0x18] sm:$0x1] (!%p107_p3), %vm158_vm2, %v1299_v0  ;;  %160 = vst.msk [vmem:[#allocation2 + $0x30] sm:$0x1] (!%p107_p3), %vm158_vm2, %v1299_v0 }
   0xb   : > { %161 = vst.msk [vmem:[#allocation2 + $0x48] sm:$0x1] (!%p107_p3), %vm158_vm2, %v1299_v0  ;;  %162 = vst.msk [vmem:[#allocation2 + $0x60] sm:$0x1] (!%p107_p3), %vm158_vm2, %v1299_v0 }
   0xc   : > { %163 = vst.msk [vmem:[#allocation2 + $0x78] sm:$0x1] (!%p107_p3), %vm158_vm2, %v1299_v0  ;;  %164 = vst.msk [vmem:[#allocation2 + $0x90] sm:$0x1] (!%p107_p3), %vm158_vm2, %v1299_v0 }
   0xd   : > { %165 = vst.msk [vmem:[#allocation2 + $0xa8] sm:$0x1] (!%p107_p3), %vm158_vm2, %v1299_v0  ;;  %166 = vst.msk [vmem:[#allocation2 + $0xc0] sm:$0x1] (!%p107_p3), %vm158_vm2, %v1299_v0 }
   0xe   : > { %167 = vst.msk [vmem:[#allocation2 + $0xd8] sm:$0x1] %vm158_vm2, %v1299_v0  ;;  %168 = vst.msk [vmem:[#allocation2 + $0xf0] sm:$0x1] %vm158_vm2, %v1299_v0  ;;  %s1707_s6 = smov (!%p132_p4, %s1289_s6), 1  ;;  %v255_v33 = vld [vmem:[#allocation2] sm:$0xff] }
   0xf   : > { %169 = vst.msk [vmem:[#allocation2 + $0x108] sm:$0x1] %vm158_vm2, %v1299_v0  ;;  %170 = vst.msk [vmem:[#allocation2 + $0x120] sm:$0x1] %vm158_vm2, %v1299_v0  ;;  %s1248_s10 = sshll.u32 %s1707_s6, 8  ;;  %v256_v34 = vld [vmem:[#allocation2 + $0x8] sm:$0xff] }
  0x10   : > { %171 = vst.msk [vmem:[#allocation2 + $0x138] sm:$0x1] %vm158_vm2, %v1299_v0  ;;  %172 = vst.msk [vmem:[#allocation2 + $0x150] sm:$0x1] %vm158_vm2, %v1299_v0  ;;  %s1378_s13 = scalar_lea.vmem %s1700_s0, %s1248_s10  ;;  %v303_v35 = vmul.f32 0.27406862, %v255_v33  ;;  %s1462_s16 = scalar_lea.vmem %s1701_s1, %s1248_s10 }
  0x11   : > { %173 = vst.msk [vmem:[#allocation2 + $0x168] sm:$0x1] %vm158_vm2, %v1299_v0  ;;  %174 = vst.msk [vmem:[#allocation2 + $0x180] sm:$0x1] %vm158_vm2, %v1299_v0  ;;  %v191_v1 = vld [vmem:[%s1378_s13] sm:$0xff]  ;;  %v192_v2 = vld [vmem:[%s1378_s13 + $0x8] sm:$0xff] }
  0x12   : > { %175 = vst.msk [vmem:[#allocation2 + $0x29] sm:$0x1] %vm158_vm2, %v1299_v0  ;;  %176 = vst.msk [vmem:[#allocation2 + $0x41] sm:$0x1] %vm158_vm2, %v1299_v0  ;;  %v193_v3 = vld [vmem:[%s1378_s13 + $0x10] sm:$0xff]  ;;  %v194_v4 = vld [vmem:[%s1378_s13 + $0x18] sm:$0xff] }
  0x13   : > { %177 = vst.msk [vmem:[#allocation2 + $0x59] sm:$0x1] %vm158_vm2, %v1299_v0  ;;  %178 = vst.msk [vmem:[#allocation2 + $0x71] sm:$0x1] %vm158_vm2, %v1299_v0  ;;  %v195_v5 = vld [vmem:[%s1378_s13 + $0x20] sm:$0xff]  ;;  %v196_v6 = vld [vmem:[%s1378_s13 + $0x28] sm:$0xff] }
  0x14   : > { %179 = vst.msk [vmem:[#allocation2 + $0x89] sm:$0x1] %vm158_vm2, %v1299_v0  ;;  %180 = vst.msk [vmem:[#allocation2 + $0xa1] sm:$0x1] %vm158_vm2, %v1299_v0  ;;  %v197_v7 = vld [vmem:[%s1378_s13 + $0x30] sm:$0xff]  ;;  %v198_v8 = vld [vmem:[%s1378_s13 + $0x38] sm:$0xff] }
  0x15   : > { %181 = vst.msk [vmem:[#allocation2 + $0xb9] sm:$0x1] %vm158_vm2, %v1299_v0  ;;  %182 = vst.msk [vmem:[#allocation2 + $0xd1] sm:$0x1] %vm158_vm2, %v1299_v0  ;;  %v199_v9 = vld [vmem:[%s1378_s13 + $0x40] sm:$0xff]  ;;  %v200_v10 = vld [vmem:[%s1378_s13 + $0x48] sm:$0xff] }
  0x16   : > { %183 = vst.msk [vmem:[#allocation2 + $0xe9] sm:$0x1] %vm158_vm2, %v1299_v0  ;;  %184 = vst.msk [vmem:[#allocation2 + $0x101] sm:$0x1] %vm158_vm2, %v1299_v0  ;;  %v201_v11 = vld [vmem:[%s1378_s13 + $0x50] sm:$0xff]  ;;  %v202_v12 = vld [vmem:[%s1378_s13 + $0x58] sm:$0xff] }
  0x17   : > { %185 = vst.msk [vmem:[#allocation2 + $0x119] sm:$0x1] %vm158_vm2, %v1299_v0  ;;  %186 = vst.msk [vmem:[#allocation2 + $0x131] sm:$0x1] %vm158_vm2, %v1299_v0  ;;  %v203_v13 = vld [vmem:[%s1378_s13 + $0x60] sm:$0xff]  ;;  %v204_v14 = vld [vmem:[%s1378_s13 + $0x68] sm:$0xff] }
  0x18   : > { %187 = vst.msk [vmem:[#allocation2 + $0x149] sm:$0x1] %vm158_vm2, %v1299_v0  ;;  %188 = vst.msk [vmem:[#allocation2 + $0x161] sm:$0x1] %vm158_vm2, %v1299_v0  ;;  %v205_v15 = vld [vmem:[%s1378_s13 + $0x70] sm:$0xff]  ;;  %v206_v16 = vld [vmem:[%s1378_s13 + $0x78] sm:$0xff] }
  0x19   : > { %189 = vst.msk [vmem:[#allocation2 + $0x179] sm:$0x1] %vm158_vm2, %v1299_v0  ;;  %190 = vst.msk [vmem:[#allocation2 + $0x191] sm:$0x1] %vm158_vm2, %v1299_v0  ;;  %v207_v17 = vld [vmem:[%s1378_s13 + $0x80] sm:$0xff]  ;;  %v208_v18 = vld [vmem:[%s1378_s13 + $0x88] sm:$0xff] }
  0x1a   : > { %223 = vst.msk [vmem:[#allocation2 + $0x19] sm:$0xff] %vm148_vm0, %v191_v1  ;;  %224 = vst.msk [vmem:[#allocation2 + $0x21] sm:$0xff] %vm148_vm0, %v192_v2  ;;  %v209_v19 = vld [vmem:[%s1378_s13 + $0x90] sm:$0xff]  ;;  %v210_v20 = vld [vmem:[%s1378_s13 + $0x98] sm:$0xff]  ;;  %v304_v38 = vmul.f32 0.27406862, %v256_v34 }
  0x1b   : > { %225 = vst.msk [vmem:[#allocation2 + $0x31] sm:$0xff] %vm148_vm0, %v193_v3  ;;  %226 = vst.msk [vmem:[#allocation2 + $0x39] sm:$0xff] %vm148_vm0, %v194_v4  ;;  %v211_v21 = vld [vmem:[%s1378_s13 + $0xa0] sm:$0xff]  ;;  %v212_v22 = vld [vmem:[%s1378_s13 + $0xa8] sm:$0xff] }
  0x1c   : > { %227 = vst.msk [vmem:[#allocation2 + $0x49] sm:$0xff] %vm148_vm0, %v195_v5  ;;  %228 = vst.msk [vmem:[#allocation2 + $0x51] sm:$0xff] %vm148_vm0, %v196_v6  ;;  %v213_v23 = vld [vmem:[%s1378_s13 + $0xb0] sm:$0xff]  ;;  %v214_v24 = vld [vmem:[%s1378_s13 + $0xb8] sm:$0xff] }
  0x1d   : > { %229 = vst.msk [vmem:[#allocation2 + $0x61] sm:$0xff] %vm148_vm0, %v197_v7  ;;  %230 = vst.msk [vmem:[#allocation2 + $0x69] sm:$0xff] %vm148_vm0, %v198_v8  ;;  %v215_v25 = vld [vmem:[%s1378_s13 + $0xc0] sm:$0xff]  ;;  %v216_v26 = vld [vmem:[%s1378_s13 + $0xc8] sm:$0xff] }
  0x1e   : > { %231 = vst.msk [vmem:[#allocation2 + $0x79] sm:$0xff] %vm148_vm0, %v199_v9  ;;  %232 = vst.msk [vmem:[#allocation2 + $0x81] sm:$0xff] %vm148_vm0, %v200_v10  ;;  %v217_v27 = vld [vmem:[%s1378_s13 + $0xd0] sm:$0xff]  ;;  %v218_v28 = vld [vmem:[%s1378_s13 + $0xd8] sm:$0xff] }
  0x1f   : > { %233 = vst.msk [vmem:[#allocation2 + $0x91] sm:$0xff] %vm148_vm0, %v201_v11  ;;  %234 = vst.msk [vmem:[#allocation2 + $0x99] sm:$0xff] %vm148_vm0, %v202_v12  ;;  %v219_v29 = vld [vmem:[%s1378_s13 + $0xe0] sm:$0xff]  ;;  %v220_v30 = vld [vmem:[%s1378_s13 + $0xe8] sm:$0xff] }
  0x20   : > { %235 = vst.msk [vmem:[#allocation2 + $0xa9] sm:$0xff] %vm148_vm0, %v203_v13  ;;  %236 = vst.msk [vmem:[#allocation2 + $0xb1] sm:$0xff] %vm148_vm0, %v204_v14  ;;  %v221_v31 = vld [vmem:[%s1378_s13 + $0xf0] sm:$0xff]  ;;  %v222_v32 = vld [vmem:[%s1378_s13 + $0xf8] sm:$0xff] }
  0x21   : > { %237 = vst.msk [vmem:[#allocation2 + $0xc1] sm:$0xff] %vm148_vm0, %v205_v15  ;;  %238 = vst.msk [vmem:[#allocation2 + $0xc9] sm:$0xff] %vm148_vm0, %v206_v16  ;;  %v351_v36 = vld [vmem:[#allocation2 + $0x18] sm:$0xff]  ;;  %v352_v37 = vld [vmem:[#allocation2 + $0x20] sm:$0xff] }
  0x22   : > { %239 = vst.msk [vmem:[#allocation2 + $0xd9] sm:$0xff] %vm148_vm0, %v207_v17  ;;  %240 = vst.msk [vmem:[#allocation2 + $0xe1] sm:$0xff] %vm148_vm0, %v208_v18  ;;  %v399_v39 = vmul.f32 0.45186275, %v351_v36  ;;  %v400_v40 = vmul.f32 0.45186275, %v352_v37 }
  0x23   : > { %241 = vst.msk [vmem:[#allocation2 + $0xf1] sm:$0xff] %vm148_vm0, %v209_v19  ;;  %242 = vst.msk [vmem:[#allocation2 + $0xf9] sm:$0xff] %vm148_vm0, %v210_v20  ;;  %v496_v41 = vld [vmem:[#allocation2 + $0x30] sm:$0xff]  ;;  %v497_v42 = vld [vmem:[#allocation2 + $0x38] sm:$0xff]  ;;  %v306_v44 = vmul.f32 0.27406862, %v351_v36 }
  0x24   : > { %243 = vst.msk [vmem:[#allocation2 + $0x109] sm:$0xff] %vm148_vm0, %v211_v21  ;;  %244 = vst.msk [vmem:[#allocation2 + $0x111] sm:$0xff] %vm148_vm0, %v212_v22  ;;  %v257_v43 = vld [vmem:[#allocation2 + $0x10] sm:$0x3]  ;;  %v447_v45 = vadd.f32 %v399_v39, %v303_v35  ;;  %v448_v46 = vadd.f32 %v400_v40, %v304_v38  ;;  %v1444_v47 = vmul.f32 0.27406862, %v496_v41 }
  0x25   : > { %245 = vst.msk [vmem:[#allocation2 + $0x121] sm:$0xff] %vm148_vm0, %v213_v23  ;;  %246 = vst.msk [vmem:[#allocation2 + $0x129] sm:$0xff] %vm148_vm0, %v214_v24  ;;  %v1446_v48 = vmul.f32 0.27406862, %v497_v42  ;;  %v353_v49 = vld [vmem:[#allocation2 + $0x28] sm:$0x3] }
  0x26   : > { %247 = vst.msk [vmem:[#allocation2 + $0x139] sm:$0xff] %vm148_vm0, %v215_v25  ;;  %248 = vst.msk [vmem:[#allocation2 + $0x141] sm:$0xff] %vm148_vm0, %v216_v26  ;;  %v305_v50 = vmul.f32 0.27406862, %v257_v43  ;;  %v401_v51 = vmul.f32 0.45186275, %v353_v49  ;;  %v592_v53 = vadd.f32 %v1444_v47, %v447_v45 }
  0x27   : > { %249 = vst.msk [vmem:[#allocation2 + $0x151] sm:$0xff] %vm148_vm0, %v217_v27  ;;  %250 = vst.msk [vmem:[#allocation2 + $0x159] sm:$0xff] %vm148_vm0, %v218_v28  ;;  %v498_v52 = vld [vmem:[#allocation2 + $0x40] sm:$0x3]  ;;  %v593_v54 = vadd.f32 %v1446_v48, %v448_v46  ;;  %v307_v56 = vmul.f32 0.27406862, %v352_v37 }
  0x28   : > { %251 = vst.msk [vmem:[#allocation2 + $0x169] sm:$0xff] %vm148_vm0, %v219_v29  ;;  %252 = vst.msk [vmem:[#allocation2 + $0x171] sm:$0xff] %vm148_vm0, %v220_v30  ;;  %v546_v55 = vmul.f32 0.27406862, %v498_v52  ;;  %v499_v57 = vld [vmem:[#allocation2 + $0x48] sm:$0xff]  ;;  %v500_v58 = vld [vmem:[#allocation2 + $0x50] sm:$0xff]  ;;  %v449_v59 = vadd.f32 %v401_v51, %v305_v50 }
  0x29   : > { %253 = vst.msk [vmem:[#allocation2 + $0x181] sm:$0xff] %vm148_vm0, %v221_v31  ;;  %254 = vst.msk [vmem:[#allocation2 + $0x189] sm:$0xff] %vm148_vm0, %v222_v32  ;;  %v402_v60 = vmul.f32 0.45186275, %v496_v41  ;;  %v403_v61 = vmul.f32 0.45186275, %v497_v42 }
  0x2a   : > { %v1450_v62 = vmul.f32 0.27406862, %v499_v57  ;;  %v640_v63 = vmul.f32 0.27406862, %v592_v53  ;;  %v641_v0 = vmul.f32 0.27406862, %v593_v54  ;;  %v594_v3 = vadd.f32 %v546_v55, %v449_v59 }
  0x2b   : > { %v672_v1 = vmul.f32 0.45186275, %v592_v53  ;;  %v673_v2 = vmul.f32 0.45186275, %v593_v54  ;;  %v450_v4 = vadd.f32 %v402_v60, %v306_v44  ;;  %v451_v5 = vadd.f32 %v403_v61, %v307_v56  ;;  %v260_v6 = vld [vmem:[#allocation2 + $0x28] sm:$0x3] }
  0x2c   : > { %v356_v7 = vld [vmem:[#allocation2 + $0x40] sm:$0x3]  ;;  %v978_v9 = vrot.slane %v640_v63, 2  ;;  %v979_v10 = vrot.slane %v641_v0, 2  ;;  %v1452_v11 = vmul.f32 0.27406862, %v500_v58 }
  0x2d   : > { %v769_v8 = vrot.slane %v672_v1, 1  ;;  %v770_v12 = vrot.slane %v673_v2, 1  ;;  %v674_v13 = vmul.f32 0.45186275, %v594_v3  ;;  %v913_v14 = vmul.f32 0.27406862, %v594_v3 }
  0x2e   : > { %v595_v15 = vadd.f32 %v1450_v62, %v450_v4  ;;  %v596_v16 = vadd.f32 %v1452_v11, %v451_v5  ;;  %v308_v17 = vmul.f32 0.27406862, %v260_v6  ;;  %v404_v18 = vmul.f32 0.45186275, %v356_v7  ;;  %v501_v23 = vld [vmem:[#allocation2 + $0x58] sm:$0x3] }
  0x2f   : > { %v771_v19 = vsel %vm768_vm3, %v769_v8, %v770_v12  ;;  %v772_v20 = vrot.slane %v674_v13, 1  ;;  %v981_v21 = vrot.slane %v913_v14, 2  ;;  %v980_v28 = vsel %vm977_vm4, %v978_v9, %v979_v10  ;;  %v502_v32 = vld [vmem:[#allocation2 + $0x60] sm:$0xff]  ;;  %v359_v38 = vld [vmem:[#allocation2 + $0x58] sm:$0x3]  ;;  %v503_v43 = vld [vmem:[#allocation2 + $0x68] sm:$0xff] }
  0x30   : > { %v642_v22 = vmul.f32 0.27406862, %v595_v15  ;;  %v881_v24 = vadd.f32 %v771_v19, %v640_v63  ;;  %v643_v25 = vmul.f32 0.27406862, %v596_v16  ;;  %v675_v26 = vmul.f32 0.45186275, %v595_v15 }
  0x31   : > { %v676_v27 = vmul.f32 0.45186275, %v596_v16  ;;  %v773_v29 = vsel %vm768_vm3, %v770_v12, %v772_v20  ;;  %v452_v31 = vadd.f32 %v404_v18, %v308_v17  ;;  %v263_v37 = vld [vmem:[#allocation2 + $0x40] sm:$0x3]  ;;  %v982_v39 = vsel %vm977_vm4, %v979_v10, %v981_v21  ;;  %v504_v54 = vld [vmem:[#allocation2 + $0x70] sm:$0x3] }
  0x32   : > { %v983_v30 = vrot.slane %v642_v22, 2  ;;  %v1090_v33 = vadd.f32 %v980_v28, %v881_v24  ;;  %v882_v34 = vadd.f32 %v773_v29, %v641_v0  ;;  %v774_v35 = vrot.slane %v675_v26, 1  ;;  %v505_v3 = vld [vmem:[#allocation2 + $0x78] sm:$0xff]  ;;  %v506_v16 = vld [vmem:[#allocation2 + $0x80] sm:$0xff]  ;;  %v507_v28 = vld [vmem:[#allocation2 + $0x88] sm:$0x3] }
  0x33   : > { %v775_v36 = vrot.slane %v676_v27, 1  ;;  %v984_v40 = vrot.slane %v643_v25, 2  ;;  %v549_v41 = vmul.f32 0.27406862, %v501_v23  ;;  %v405_v42 = vmul.f32 0.45186275, %v499_v57 }
  0x34   : > { %1122 = vst.msk [vmem:[%s1462_s16] sm:$0xff] %vm148_vm0, %v1090_v33  ;;  %v1091_v44 = vadd.f32 %v982_v39, %v882_v34  ;;  %v406_v46 = vmul.f32 0.45186275, %v500_v58  ;;  %v1470_v49 = vmul.f32 0.27406862, %v502_v32 }
  0x35   : > { %v776_v45 = vsel %vm768_vm3, %v774_v35, %v775_v36  ;;  %v985_v51 = vsel %vm977_vm4, %v983_v30, %v984_v40  ;;  %v597_v52 = vadd.f32 %v549_v41, %v452_v31  ;;  %v453_v53 = vadd.f32 %v1444_v47, %v405_v42  ;;  %v266_v17 = vld [vmem:[#allocation2 + $0x58] sm:$0x3]  ;;  %v508_v42 = vld [vmem:[#allocation2 + $0x90] sm:$0xff] }
  0x36   : > { %v883_v50 = vadd.f32 %v776_v45, %v642_v22  ;;  %1123 = vst.msk [vmem:[%s1462_s16 + $0x8] sm:$0xff] %vm148_vm0, %v1091_v44  ;;  %v454_v55 = vadd.f32 %v1446_v48, %v406_v46  ;;  %v1477_v56 = vmul.f32 0.27406862, %v503_v43  ;;  %v311_v57 = vmul.f32 0.27406862, %v263_v37 }
  0x37   : > { %v407_v59 = vmul.f32 0.45186275, %v359_v38  ;;  %v677_v58 = vmul.f32 0.45186275, %v597_v52  ;;  %v914_v61 = vmul.f32 0.27406862, %v597_v52  ;;  %v598_v63 = vadd.f32 %v1470_v49, %v453_v53 }
  0x38   : > { %v1092_v60 = vadd.f32 %v985_v51, %v883_v50  ;;  %v599_v0 = vadd.f32 %v1477_v56, %v454_v55  ;;  %v552_v2 = vmul.f32 0.27406862, %v504_v54  ;;  %v408_v47 = vmul.f32 0.45186275, %v502_v32  ;;  %v362_v22 = vld [vmem:[#allocation2 + $0x70] sm:$0x3] }
  0x39   : > { %v455_v1 = vadd.f32 %v407_v59, %v311_v57  ;;  %v777_v4 = vrot.slane %v677_v58, 1  ;;  %v986_v5 = vrot.slane %v914_v61, 2  ;;  %v644_v48 = vmul.f32 0.27406862, %v598_v63  ;;  %v269_v58 = vld [vmem:[#allocation2 + $0x70] sm:$0x3] }
  0x3a   : > { %1124 = vst.msk [vmem:[%s1462_s16 + $0x10] sm:$0xff] %vm148_vm0, %v1092_v60  ;;  %v678_v6 = vmul.f32 0.45186275, %v598_v63  ;;  %v645_v7 = vmul.f32 0.27406862, %v599_v0  ;;  %v456_v24 = vadd.f32 %v1450_v62, %v408_v47 }
  0x3b   : > { %v679_v8 = vmul.f32 0.45186275, %v599_v0  ;;  %v600_v9 = vadd.f32 %v552_v2, %v455_v1  ;;  %v409_v10 = vmul.f32 0.45186275, %v503_v43  ;;  %v778_v12 = vsel %vm768_vm3, %v775_v36, %v777_v4  ;;  %v509_v43 = vld [vmem:[#allocation2 + $0x98] sm:$0xff] }
  0x3c   : > { %v987_v13 = vsel %vm977_vm4, %v984_v40, %v986_v5  ;;  %v779_v14 = vrot.slane %v678_v6, 1  ;;  %v988_v15 = vrot.slane %v644_v48, 2  ;;  %v884_v18 = vadd.f32 %v778_v12, %v643_v25  ;;  %v365_v2 = vld [vmem:[#allocation2 + $0x88] sm:$0x3] }
  0x3d   : > { %v780_v19 = vrot.slane %v679_v8, 1  ;;  %v989_v20 = vrot.slane %v645_v7, 2  ;;  %v680_v21 = vmul.f32 0.45186275, %v600_v9  ;;  %v915_v23 = vmul.f32 0.27406862, %v600_v9 }
  0x3e   : > { %v457_v26 = vadd.f32 %v1452_v11, %v409_v10  ;;  %v1487_v27 = vmul.f32 0.27406862, %v505_v3  ;;  %v1093_v29 = vadd.f32 %v987_v13, %v884_v18  ;;  %v1491_v34 = vmul.f32 0.27406862, %v506_v16  ;;  %v510_v10 = vld [vmem:[#allocation2 + $0xa0] sm:$0x3] }
  0x3f   : > { %v781_v30 = vsel %vm768_vm3, %v779_v14, %v780_v19  ;;  %v990_v31 = vsel %vm977_vm4, %v988_v15, %v989_v20  ;;  %v782_v32 = vrot.slane %v680_v21, 1  ;;  %v991_v33 = vrot.slane %v915_v23, 2  ;;  %v272_v21 = vld [vmem:[#allocation2 + $0x88] sm:$0x3] }
  0x40   : > { %v885_v25 = vadd.f32 %v781_v30, %v644_v48  ;;  %v601_v35 = vadd.f32 %v1487_v27, %v456_v24  ;;  %1125 = vst.msk [vmem:[%s1462_s16 + $0x18] sm:$0xff] %vm148_vm0, %v1093_v29  ;;  %v314_v11 = vmul.f32 0.27406862, %v266_v17  ;;  %v410_v36 = vmul.f32 0.45186275, %v362_v22 }
  0x41   : > { %v783_v62 = vsel %vm768_vm3, %v780_v19, %v782_v32  ;;  %v555_v37 = vmul.f32 0.27406862, %v507_v28  ;;  %v992_v40 = vsel %vm977_vm4, %v989_v20, %v991_v33  ;;  %v602_v41 = vadd.f32 %v1491_v34, %v457_v26  ;;  %v511_v19 = vld [vmem:[#allocation2 + $0xa8] sm:$0xff]  ;;  %v512_v20 = vld [vmem:[#allocation2 + $0xb0] sm:$0xff]  ;;  %v368_v28 = vld [vmem:[#allocation2 + $0xa0] sm:$0x3] }
  0x42   : > { %v1094_v38 = vadd.f32 %v990_v31, %v885_v25  ;;  %v886_v39 = vadd.f32 %v783_v62, %v645_v7  ;;  %v646_v44 = vmul.f32 0.27406862, %v601_v35  ;;  %v681_v45 = vmul.f32 0.45186275, %v601_v35 }
  0x43   : > { %v458_v46 = vadd.f32 %v410_v36, %v314_v11  ;;  %v411_v50 = vmul.f32 0.45186275, %v505_v3  ;;  %v647_v52 = vmul.f32 0.27406862, %v602_v41  ;;  %v682_v53 = vmul.f32 0.45186275, %v602_v41 }
  0x44   : > { %1126 = vst.msk [vmem:[%s1462_s16 + $0x20] sm:$0xff] %vm148_vm0, %v1094_v38  ;;  %v1095_v51 = vadd.f32 %v992_v40, %v886_v39  ;;  %v412_v54 = vmul.f32 0.45186275, %v506_v16  ;;  %v784_v55 = vrot.slane %v681_v45, 1  ;;  %v993_v57 = vrot.slane %v646_v44, 2 }
  0x45   : > { %v603_v59 = vadd.f32 %v555_v37, %v458_v46  ;;  %v459_v60 = vadd.f32 %v1470_v49, %v411_v50  ;;  %v785_v61 = vrot.slane %v682_v53, 1  ;;  %v994_v63 = vrot.slane %v647_v52, 2  ;;  %v513_v39 = vld [vmem:[#allocation2 + $0xb8] sm:$0x3] }
  0x46   : > { %1127 = vst.msk [vmem:[%s1462_s16 + $0x28] sm:$0xff] %vm148_vm0, %v1095_v51  ;;  %v460_v0 = vadd.f32 %v1477_v56, %v412_v54  ;;  %v1505_v1 = vmul.f32 0.27406862, %v508_v42  ;;  %v1507_v4 = vmul.f32 0.27406862, %v509_v43 }
  0x47   : > { %v683_v47 = vmul.f32 0.45186275, %v603_v59  ;;  %v916_v3 = vmul.f32 0.27406862, %v603_v59  ;;  %v786_v5 = vsel %vm768_vm3, %v784_v55, %v785_v61  ;;  %v317_v6 = vmul.f32 0.27406862, %v269_v58 }
  0x48   : > { %v604_v48 = vadd.f32 %v1505_v1, %v459_v60  ;;  %v887_v49 = vadd.f32 %v786_v5, %v646_v44  ;;  %v605_v9 = vadd.f32 %v1507_v4, %v460_v0  ;;  %v995_v56 = vsel %vm977_vm4, %v993_v57, %v994_v63 }
  0x49   : > { %v787_v7 = vrot.slane %v683_v47, 1  ;;  %v996_v8 = vrot.slane %v916_v3, 2  ;;  %v413_v14 = vmul.f32 0.45186275, %v365_v2  ;;  %v558_v31 = vmul.f32 0.27406862, %v510_v10 }
  0x4a   : > { %v648_v12 = vmul.f32 0.27406862, %v604_v48  ;;  %v684_v13 = vmul.f32 0.45186275, %v604_v48  ;;  %v1096_v15 = vadd.f32 %v995_v56, %v887_v49  ;;  %v649_v18 = vmul.f32 0.27406862, %v605_v9 }
  0x4b   : > { %v788_v16 = vsel %vm768_vm3, %v785_v61, %v787_v7  ;;  %v997_v17 = vsel %vm977_vm4, %v994_v63, %v996_v8  ;;  %v685_v23 = vmul.f32 0.45186275, %v605_v9  ;;  %v461_v30 = vadd.f32 %v413_v14, %v317_v6  ;;  %v514_v3 = vld [vmem:[#allocation2 + $0xc0] sm:$0xff]  ;;  %v515_v7 = vld [vmem:[#allocation2 + $0xc8] sm:$0xff] }
  0x4c   : > { %v888_v22 = vadd.f32 %v788_v16, %v647_v52  ;;  %v789_v24 = vrot.slane %v684_v13, 1  ;;  %v998_v26 = vrot.slane %v648_v12, 2  ;;  %1128 = vst.msk [vmem:[%s1462_s16 + $0x30] sm:$0xff] %vm148_vm0, %v1096_v15  ;;  %v999_v29 = vrot.slane %v649_v18, 2  ;;  %v275_v8 = vld [vmem:[#allocation2 + $0xa0] sm:$0x3] }
  0x4d   : > { %v414_v32 = vmul.f32 0.45186275, %v508_v42  ;;  %v790_v33 = vrot.slane %v685_v23, 1  ;;  %v415_v35 = vmul.f32 0.45186275, %v509_v43  ;;  %v606_v36 = vadd.f32 %v558_v31, %v461_v30 }
  0x4e   : > { %v1097_v25 = vadd.f32 %v997_v17, %v888_v22  ;;  %v1517_v62 = vmul.f32 0.27406862, %v511_v19  ;;  %v1000_v11 = vsel %vm977_vm4, %v998_v26, %v999_v29  ;;  %v1521_v38 = vmul.f32 0.27406862, %v512_v20  ;;  %v371_v13 = vld [vmem:[#allocation2 + $0xb8] sm:$0x3] }
  0x4f   : > { %v462_v37 = vadd.f32 %v1487_v27, %v414_v32  ;;  %v791_v40 = vsel %vm768_vm3, %v789_v24, %v790_v33  ;;  %v463_v41 = vadd.f32 %v1491_v34, %v415_v35  ;;  %v320_v42 = vmul.f32 0.27406862, %v272_v21  ;;  %v516_v17 = vld [vmem:[#allocation2 + $0xd0] sm:$0x3]  ;;  %v518_v35 = vld [vmem:[#allocation2 + $0xe0] sm:$0xff] }
  0x50   : > { %1129 = vst.msk [vmem:[%s1462_s16 + $0x38] sm:$0xff] %vm148_vm0, %v1097_v25  ;;  %v416_v44 = vmul.f32 0.45186275, %v368_v28  ;;  %v889_v45 = vadd.f32 %v791_v40, %v648_v12  ;;  %v686_v43 = vmul.f32 0.45186275, %v606_v36 }
  0x51   : > { %v917_v46 = vmul.f32 0.27406862, %v606_v36  ;;  %v607_v50 = vadd.f32 %v1517_v62, %v462_v37  ;;  %v608_v51 = vadd.f32 %v1521_v38, %v463_v41  ;;  %v561_v52 = vmul.f32 0.27406862, %v513_v39 }
  0x52   : > { %v464_v27 = vadd.f32 %v416_v44, %v320_v42  ;;  %v417_v53 = vmul.f32 0.45186275, %v511_v19  ;;  %v1098_v54 = vadd.f32 %v1000_v11, %v889_v45  ;;  %v792_v55 = vrot.slane %v686_v43, 1  ;;  %v278_v45 = vld [vmem:[#allocation2 + $0xb8] sm:$0x3] }
  0x53   : > { %v1001_v57 = vrot.slane %v917_v46, 2  ;;  %v650_v59 = vmul.f32 0.27406862, %v607_v50  ;;  %v651_v60 = vmul.f32 0.27406862, %v608_v51 }
  0x54   : > { %v687_v58 = vmul.f32 0.45186275, %v607_v50  ;;  %v688_v34 = vmul.f32 0.45186275, %v608_v51  ;;  %v609_v61 = vadd.f32 %v561_v52, %v464_v27  ;;  %1130 = vst.msk [vmem:[%s1462_s16 + $0x40] sm:$0xff] %vm148_vm0, %v1098_v54  ;;  %v793_v63 = vsel %vm768_vm3, %v790_v33, %v792_v55  ;;  %v517_v33 = vld [vmem:[#allocation2 + $0xd8] sm:$0xff] }
  0x55   : > { %v1002_v0 = vsel %vm977_vm4, %v999_v29, %v1001_v57  ;;  %v1003_v2 = vrot.slane %v650_v59, 2  ;;  %v418_v47 = vmul.f32 0.45186275, %v512_v20  ;;  %v890_v5 = vadd.f32 %v793_v63, %v649_v18  ;;  %v374_v43 = vld [vmem:[#allocation2 + $0xd0] sm:$0x3] }
  0x56   : > { %v794_v48 = vrot.slane %v687_v58, 1  ;;  %v795_v6 = vrot.slane %v688_v34, 1  ;;  %v1004_v49 = vrot.slane %v651_v60, 2  ;;  %v689_v9 = vmul.f32 0.45186275, %v609_v61 }
  0x57   : > { %v918_v10 = vmul.f32 0.27406862, %v609_v61  ;;  %v465_v56 = vadd.f32 %v1505_v1, %v417_v53  ;;  %v466_v12 = vadd.f32 %v1507_v4, %v418_v47  ;;  %v1099_v14 = vadd.f32 %v1002_v0, %v890_v5  ;;  %v519_v52 = vld [vmem:[#allocation2 + $0xe8] sm:$0x3] }
  0x58   : > { %v796_v15 = vsel %vm768_vm3, %v794_v48, %v795_v6  ;;  %v1536_v16 = vmul.f32 0.27406862, %v514_v3  ;;  %v797_v19 = vrot.slane %v689_v9, 1  ;;  %v1538_v21 = vmul.f32 0.27406862, %v515_v7 }
  0x59   : > { %v891_v18 = vadd.f32 %v796_v15, %v650_v59  ;;  %v1006_v20 = vrot.slane %v918_v10, 2  ;;  %1131 = vst.msk [vmem:[%s1462_s16 + $0x48] sm:$0xff] %vm148_vm0, %v1099_v14  ;;  %v1005_v22 = vsel %vm977_vm4, %v1003_v2, %v1004_v49  ;;  %v323_v4 = vmul.f32 0.27406862, %v275_v8 }
  0x5a   : > { %v610_v1 = vadd.f32 %v1536_v16, %v465_v56  ;;  %v419_v23 = vmul.f32 0.45186275, %v371_v13  ;;  %v798_v26 = vsel %vm768_vm3, %v795_v6, %v797_v19  ;;  %v611_v28 = vadd.f32 %v1538_v21, %v466_v12 }
  0x5b   : > { %v1100_v24 = vadd.f32 %v1005_v22, %v891_v18  ;;  %v564_v29 = vmul.f32 0.27406862, %v516_v17  ;;  %v892_v30 = vadd.f32 %v798_v26, %v651_v60  ;;  %v1007_v11 = vsel %vm977_vm4, %v1004_v49, %v1006_v20  ;;  %v521_v17 = vld [vmem:[#allocation2 + $0xf8] sm:$0xff]  ;;  %v377_v26 = vld [vmem:[#allocation2 + $0xe8] sm:$0x3] }
  0x5c   : > { %v652_v31 = vmul.f32 0.27406862, %v610_v1  ;;  %v690_v32 = vmul.f32 0.45186275, %v610_v1  ;;  %v467_v25 = vadd.f32 %v419_v23, %v323_v4  ;;  %v653_v36 = vmul.f32 0.27406862, %v611_v28 }
  0x5d   : > { %1132 = vst.msk [vmem:[%s1462_s16 + $0x50] sm:$0xff] %vm148_vm0, %v1100_v24  ;;  %v691_v37 = vmul.f32 0.45186275, %v611_v28  ;;  %v420_v39 = vmul.f32 0.45186275, %v514_v3  ;;  %v1101_v40 = vadd.f32 %v1007_v11, %v892_v30 }
  0x5e   : > { %v799_v41 = vrot.slane %v690_v32, 1  ;;  %v1008_v42 = vrot.slane %v652_v31, 2  ;;  %v612_v44 = vadd.f32 %v564_v29, %v467_v25  ;;  %v1009_v50 = vrot.slane %v653_v36, 2  ;;  %v522_v28 = vld [vmem:[#allocation2 + $0x100] sm:$0x3] }
  0x5f   : > { %v800_v46 = vrot.slane %v691_v37, 1  ;;  %v421_v51 = vmul.f32 0.45186275, %v515_v7  ;;  %v468_v27 = vadd.f32 %v1517_v62, %v420_v39  ;;  %1133 = vst.msk [vmem:[%s1462_s16 + $0x58] sm:$0xff] %vm148_vm0, %v1101_v40  ;;  %v1552_v55 = vmul.f32 0.27406862, %v517_v33 }
  0x60   : > { %v692_v53 = vmul.f32 0.45186275, %v612_v44  ;;  %v919_v54 = vmul.f32 0.27406862, %v612_v44  ;;  %v1010_v59 = vsel %vm977_vm4, %v1008_v42, %v1009_v50  ;;  %v1557_v58 = vmul.f32 0.27406862, %v518_v35 }
  0x61   : > { %v801_v57 = vsel %vm768_vm3, %v799_v41, %v800_v46  ;;  %v469_v60 = vadd.f32 %v1521_v38, %v421_v51  ;;  %v613_v62 = vadd.f32 %v1552_v55, %v468_v27  ;;  %v326_v2 = vmul.f32 0.27406862, %v278_v45  ;;  %v520_v38 = vld [vmem:[#allocation2 + $0xf0] sm:$0xff]  ;;  %v523_v44 = vld [vmem:[#allocation2 + $0x108] sm:$0xff] }
  0x62   : > { %v893_v34 = vadd.f32 %v801_v57, %v652_v31  ;;  %v802_v61 = vrot.slane %v692_v53, 1  ;;  %v1011_v63 = vrot.slane %v919_v54, 2  ;;  %v422_v47 = vmul.f32 0.45186275, %v374_v43  ;;  %v281_v7 = vld [vmem:[#allocation2 + $0xd0] sm:$0x3] }
  0x63   : > { %v614_v0 = vadd.f32 %v1557_v58, %v469_v60  ;;  %v567_v3 = vmul.f32 0.27406862, %v519_v52  ;;  %v654_v49 = vmul.f32 0.27406862, %v613_v62  ;;  %v693_v10 = vmul.f32 0.45186275, %v613_v62 }
  0x64   : > { %v1102_v5 = vadd.f32 %v1010_v59, %v893_v34  ;;  %v803_v48 = vsel %vm768_vm3, %v800_v46, %v802_v61  ;;  %v1012_v6 = vsel %vm977_vm4, %v1009_v50, %v1011_v63  ;;  %v470_v13 = vadd.f32 %v422_v47, %v326_v2  ;;  %v524_v54 = vld [vmem:[#allocation2 + $0x110] sm:$0xff]  ;;  %v284_v61 = vld [vmem:[#allocation2 + $0xe8] sm:$0x3]  ;;  %v380_v47 = vld [vmem:[#allocation2 + $0x100] sm:$0x3] }
  0x65   : > { %v894_v8 = vadd.f32 %v803_v48, %v653_v36  ;;  %v655_v9 = vmul.f32 0.27406862, %v614_v0  ;;  %v694_v56 = vmul.f32 0.45186275, %v614_v0  ;;  %v1013_v12 = vrot.slane %v654_v49, 2 }
  0x66   : > { %1134 = vst.msk [vmem:[%s1462_s16 + $0x60] sm:$0xff] %vm148_vm0, %v1102_v5  ;;  %v423_v14 = vmul.f32 0.45186275, %v517_v33  ;;  %v424_v15 = vmul.f32 0.45186275, %v518_v35  ;;  %v804_v19 = vrot.slane %v693_v10, 1  ;;  %v615_v1 = vadd.f32 %v567_v3, %v470_v13 }
  0x67   : > { %v1103_v18 = vadd.f32 %v1012_v6, %v894_v8  ;;  %v805_v20 = vrot.slane %v694_v56, 1  ;;  %v1014_v22 = vrot.slane %v655_v9, 2  ;;  %v1567_v24 = vmul.f32 0.27406862, %v520_v38  ;;  %v525_v3 = vld [vmem:[#allocation2 + $0x118] sm:$0x3] }
  0x68   : > { %v471_v4 = vadd.f32 %v1536_v16, %v423_v14  ;;  %v472_v23 = vadd.f32 %v1538_v21, %v424_v15  ;;  %v1573_v31 = vmul.f32 0.27406862, %v521_v17  ;;  %v329_v32 = vmul.f32 0.27406862, %v281_v7 }
  0x69   : > { %1135 = vst.msk [vmem:[%s1462_s16 + $0x68] sm:$0xff] %vm148_vm0, %v1103_v18  ;;  %v806_v29 = vsel %vm768_vm3, %v804_v19, %v805_v20  ;;  %v1015_v30 = vsel %vm977_vm4, %v1013_v12, %v1014_v22  ;;  %v695_v33 = vmul.f32 0.45186275, %v615_v1  ;;  %v920_v35 = vmul.f32 0.27406862, %v615_v1 }
  0x6a   : > { %v895_v25 = vadd.f32 %v806_v29, %v654_v49  ;;  %v616_v16 = vadd.f32 %v1567_v24, %v471_v4  ;;  %v617_v21 = vadd.f32 %v1573_v31, %v472_v23  ;;  %v425_v11 = vmul.f32 0.45186275, %v377_v26  ;;  %v287_v29 = vld [vmem:[#allocation2 + $0x100] sm:$0x3] }
  0x6b   : > { %v570_v36 = vmul.f32 0.27406862, %v522_v28  ;;  %v426_v37 = vmul.f32 0.45186275, %v520_v38  ;;  %v807_v40 = vrot.slane %v695_v33, 1  ;;  %v1016_v41 = vrot.slane %v920_v35, 2 }
  0x6c   : > { %v1104_v39 = vadd.f32 %v1015_v30, %v895_v25  ;;  %v656_v42 = vmul.f32 0.27406862, %v616_v16  ;;  %v657_v45 = vmul.f32 0.27406862, %v617_v21  ;;  %v696_v43 = vmul.f32 0.45186275, %v616_v16 }
  0x6d   : > { %v697_v46 = vmul.f32 0.45186275, %v617_v21  ;;  %v473_v50 = vadd.f32 %v425_v11, %v329_v32  ;;  %v808_v51 = vsel %vm768_vm3, %v805_v20, %v807_v40  ;;  %v1017_v27 = vsel %vm977_vm4, %v1014_v22, %v1016_v41  ;;  %v527_v28 = vld [vmem:[#allocation2 + $0x128] sm:$0xff]  ;;  %v383_v35 = vld [vmem:[#allocation2 + $0x118] sm:$0x3] }
  0x6e   : > { %1136 = vst.msk [vmem:[%s1462_s16 + $0x70] sm:$0xff] %vm148_vm0, %v1104_v39  ;;  %v1018_v52 = vrot.slane %v656_v42, 2  ;;  %v427_v53 = vmul.f32 0.45186275, %v521_v17  ;;  %v896_v57 = vadd.f32 %v808_v51, %v655_v9  ;;  %v809_v59 = vrot.slane %v696_v43, 1  ;;  %v526_v17 = vld [vmem:[#allocation2 + $0x120] sm:$0xff] }
  0x6f   : > { %v810_v60 = vrot.slane %v697_v46, 1  ;;  %v1019_v34 = vrot.slane %v657_v45, 2  ;;  %v618_v63 = vadd.f32 %v570_v36, %v473_v50  ;;  %v474_v62 = vadd.f32 %v1552_v55, %v426_v37  ;;  %v528_v37 = vld [vmem:[#allocation2 + $0x130] sm:$0x3] }
  0x70   : > { %v475_v0 = vadd.f32 %v1557_v58, %v427_v53  ;;  %v1583_v2 = vmul.f32 0.27406862, %v523_v44  ;;  %v1105_v5 = vadd.f32 %v1017_v27, %v896_v57  ;;  %v1587_v49 = vmul.f32 0.27406862, %v524_v54 }
  0x71   : > { %v811_v48 = vsel %vm768_vm3, %v809_v59, %v810_v60  ;;  %v1020_v6 = vsel %vm977_vm4, %v1018_v52, %v1019_v34  ;;  %v698_v7 = vmul.f32 0.45186275, %v618_v63  ;;  %v921_v8 = vmul.f32 0.27406862, %v618_v63 }
  0x72   : > { %v897_v38 = vadd.f32 %v811_v48, %v656_v42  ;;  %v619_v9 = vadd.f32 %v1583_v2, %v474_v62  ;;  %1137 = vst.msk [vmem:[%s1462_s16 + $0x78] sm:$0xff] %vm148_vm0, %v1105_v5  ;;  %v620_v55 = vadd.f32 %v1587_v49, %v475_v0  ;;  %v332_v58 = vmul.f32 0.27406862, %v284_v61 }
  0x73   : > { %v428_v10 = vmul.f32 0.45186275, %v380_v47  ;;  %v573_v56 = vmul.f32 0.27406862, %v525_v3  ;;  %v812_v13 = vrot.slane %v698_v7, 1  ;;  %v1021_v14 = vrot.slane %v921_v8, 2 }
  0x74   : > { %v1106_v12 = vadd.f32 %v1020_v6, %v897_v38  ;;  %v658_v15 = vmul.f32 0.27406862, %v619_v9  ;;  %v659_v18 = vmul.f32 0.27406862, %v620_v55  ;;  %v699_v19 = vmul.f32 0.45186275, %v619_v9 }
  0x75   : > { %v700_v20 = vmul.f32 0.45186275, %v620_v55  ;;  %v476_v22 = vadd.f32 %v428_v10, %v332_v58  ;;  %v813_v1 = vsel %vm768_vm3, %v810_v60, %v812_v13  ;;  %v1022_v4 = vsel %vm977_vm4, %v1019_v34, %v1021_v14  ;;  %v529_v47 = vld [vmem:[#allocation2 + $0x138] sm:$0xff]  ;;  %v530_v3 = vld [vmem:[#allocation2 + $0x140] sm:$0xff]  ;;  %v386_v8 = vld [vmem:[#allocation2 + $0x130] sm:$0x3] }
  0x76   : > { %1138 = vst.msk [vmem:[%s1462_s16 + $0x80] sm:$0xff] %vm148_vm0, %v1106_v12  ;;  %v1023_v23 = vrot.slane %v658_v15, 2  ;;  %v429_v26 = vmul.f32 0.45186275, %v523_v44  ;;  %v898_v30 = vadd.f32 %v813_v1, %v657_v45  ;;  %v814_v32 = vrot.slane %v699_v19, 1 }
  0x77   : > { %v815_v25 = vrot.slane %v700_v20, 1  ;;  %v1024_v33 = vrot.slane %v659_v18, 2  ;;  %v621_v16 = vadd.f32 %v573_v56, %v476_v22  ;;  %v430_v21 = vmul.f32 0.45186275, %v524_v54  ;;  %v290_v7 = vld [vmem:[#allocation2 + $0x118] sm:$0x3] }
  0x78   : > { %v477_v11 = vadd.f32 %v1567_v24, %v429_v26  ;;  %v1598_v36 = vmul.f32 0.27406862, %v526_v17  ;;  %v1107_v39 = vadd.f32 %v1022_v4, %v898_v30  ;;  %v1602_v42 = vmul.f32 0.27406862, %v527_v28  ;;  %v531_v56 = vld [vmem:[#allocation2 + $0x148] sm:$0x3] }
  0x79   : > { %v816_v40 = vsel %vm768_vm3, %v814_v32, %v815_v25  ;;  %v1025_v41 = vsel %vm977_vm4, %v1023_v23, %v1024_v33  ;;  %v701_v45 = vmul.f32 0.45186275, %v621_v16  ;;  %v922_v43 = vmul.f32 0.27406862, %v621_v16 }
  0x7a   : > { %v899_v44 = vadd.f32 %v816_v40, %v658_v15  ;;  %v478_v46 = vadd.f32 %v1573_v31, %v430_v21  ;;  %1139 = vst.msk [vmem:[%s1462_s16 + $0x88] sm:$0xff] %vm148_vm0, %v1107_v39  ;;  %v622_v24 = vadd.f32 %v1598_v36, %v477_v11  ;;  %v335_v50 = vmul.f32 0.27406862, %v287_v29 }
  0x7b   : > { %v431_v51 = vmul.f32 0.45186275, %v383_v35  ;;  %v576_v27 = vmul.f32 0.27406862, %v528_v37  ;;  %v817_v53 = vrot.slane %v701_v45, 1  ;;  %v1026_v54 = vrot.slane %v922_v43, 2 }
  0x7c   : > { %v1108_v52 = vadd.f32 %v1025_v41, %v899_v44  ;;  %v623_v57 = vadd.f32 %v1602_v42, %v478_v46  ;;  %v660_v59 = vmul.f32 0.27406862, %v622_v24  ;;  %v702_v60 = vmul.f32 0.45186275, %v622_v24  ;;  %v293_v35 = vld [vmem:[#allocation2 + $0x130] sm:$0x3] }
  0x7d   : > { %v479_v34 = vadd.f32 %v431_v51, %v335_v50  ;;  %v432_v61 = vmul.f32 0.45186275, %v526_v17  ;;  %v818_v31 = vsel %vm768_vm3, %v815_v25, %v817_v53  ;;  %v1027_v63 = vsel %vm977_vm4, %v1024_v33, %v1026_v54  ;;  %v532_v33 = vld [vmem:[#allocation2 + $0x150] sm:$0xff]  ;;  %v533_v45 = vld [vmem:[#allocation2 + $0x158] sm:$0xff]  ;;  %v389_v54 = vld [vmem:[#allocation2 + $0x148] sm:$0x3] }
  0x7e   : > { %1140 = vst.msk [vmem:[%s1462_s16 + $0x90] sm:$0xff] %vm148_vm0, %v1108_v52  ;;  %v661_v62 = vmul.f32 0.27406862, %v623_v57  ;;  %v703_v0 = vmul.f32 0.45186275, %v623_v57  ;;  %v900_v5 = vadd.f32 %v818_v31, %v659_v18  ;;  %v819_v48 = vrot.slane %v702_v60, 1 }
  0x7f   : > { %v1028_v6 = vrot.slane %v660_v59, 2  ;;  %v624_v38 = vadd.f32 %v576_v27, %v479_v34  ;;  %v433_v58 = vmul.f32 0.45186275, %v527_v28  ;;  %v480_v10 = vadd.f32 %v1583_v2, %v432_v61  ;;  %v534_v57 = vld [vmem:[#allocation2 + $0x160] sm:$0x3] }
  0x80   : > { %v820_v9 = vrot.slane %v703_v0, 1  ;;  %v1029_v55 = vrot.slane %v661_v62, 2  ;;  %v1109_v12 = vadd.f32 %v1027_v63, %v900_v5  ;;  %v1614_v15 = vmul.f32 0.27406862, %v529_v47 }
  0x81   : > { %v704_v13 = vmul.f32 0.45186275, %v624_v38  ;;  %v923_v14 = vmul.f32 0.27406862, %v624_v38  ;;  %v481_v19 = vadd.f32 %v1587_v49, %v433_v58  ;;  %v1619_v20 = vmul.f32 0.27406862, %v530_v3 }
  0x82   : > { %v821_v17 = vsel %vm768_vm3, %v819_v48, %v820_v9  ;;  %v1030_v18 = vsel %vm977_vm4, %v1028_v6, %v1029_v55  ;;  %1141 = vst.msk [vmem:[%s1462_s16 + $0x98] sm:$0xff] %vm148_vm0, %v1109_v12  ;;  %v625_v2 = vadd.f32 %v1614_v15, %v480_v10  ;;  %v338_v26 = vmul.f32 0.27406862, %v290_v7  ;;  %v535_v7 = vld [vmem:[#allocation2 + $0x168] sm:$0xff] }
  0x83   : > { %v901_v22 = vadd.f32 %v821_v17, %v660_v59  ;;  %v822_v1 = vrot.slane %v704_v13, 1  ;;  %v1031_v4 = vrot.slane %v923_v14, 2  ;;  %v626_v23 = vadd.f32 %v1619_v20, %v481_v19  ;;  %v536_v14 = vld [vmem:[#allocation2 + $0x170] sm:$0xff] }
  0x84   : > { %v434_v28 = vmul.f32 0.45186275, %v386_v8  ;;  %v579_v29 = vmul.f32 0.27406862, %v531_v56  ;;  %v662_v25 = vmul.f32 0.27406862, %v625_v2 }
  0x85   : > { %v1110_v30 = vadd.f32 %v1030_v18, %v901_v22  ;;  %v823_v32 = vsel %vm768_vm3, %v820_v9, %v822_v1  ;;  %v1032_v49 = vsel %vm977_vm4, %v1029_v55, %v1031_v4  ;;  %v663_v21 = vmul.f32 0.27406862, %v626_v23  ;;  %v296_v1 = vld [vmem:[#allocation2 + $0x148] sm:$0x3] }
  0x86   : > { %v902_v16 = vadd.f32 %v823_v32, %v661_v62  ;;  %v705_v11 = vmul.f32 0.45186275, %v625_v2  ;;  %v706_v37 = vmul.f32 0.45186275, %v626_v23  ;;  %v1033_v39 = vrot.slane %v662_v25, 2 }
  0x87   : > { %1142 = vst.msk [vmem:[%s1462_s16 + $0xa0] sm:$0xff] %vm148_vm0, %v1110_v30  ;;  %v482_v40 = vadd.f32 %v434_v28, %v338_v26  ;;  %v435_v41 = vmul.f32 0.45186275, %v529_v47  ;;  %v436_v44 = vmul.f32 0.45186275, %v530_v3  ;;  %v1034_v50 = vrot.slane %v663_v21, 2 }
  0x88   : > { %v1111_v43 = vadd.f32 %v1032_v49, %v902_v16  ;;  %v824_v46 = vrot.slane %v705_v11, 1  ;;  %v825_v24 = vrot.slane %v706_v37, 1  ;;  %v1631_v53 = vmul.f32 0.27406862, %v532_v33  ;;  %v392_v28 = vld [vmem:[#allocation2 + $0x160] sm:$0x3] }
  0x89   : > { %v627_v51 = vadd.f32 %v579_v29, %v482_v40  ;;  %v483_v27 = vadd.f32 %v1598_v36, %v435_v41  ;;  %v484_v52 = vadd.f32 %v1602_v42, %v436_v44  ;;  %v1035_v60 = vsel %vm977_vm4, %v1033_v39, %v1034_v50  ;;  %v537_v29 = vld [vmem:[#allocation2 + $0x178] sm:$0x3] }
  0x8a   : > { %1143 = vst.msk [vmem:[%s1462_s16 + $0xa8] sm:$0xff] %vm148_vm0, %v1111_v43  ;;  %v826_v59 = vsel %vm768_vm3, %v824_v46, %v825_v24  ;;  %v1637_v34 = vmul.f32 0.27406862, %v533_v45  ;;  %v341_v61 = vmul.f32 0.27406862, %v293_v35 }
  0x8b   : > { %v903_v31 = vadd.f32 %v826_v59, %v662_v25  ;;  %v707_v63 = vmul.f32 0.45186275, %v627_v51  ;;  %v924_v62 = vmul.f32 0.27406862, %v627_v51  ;;  %v628_v36 = vadd.f32 %v1631_v53, %v483_v27  ;;  %v299_v59 = vld [vmem:[#allocation2 + $0x160] sm:$0x3] }
  0x8c   : > { %v629_v42 = vadd.f32 %v1637_v34, %v484_v52  ;;  %v437_v0 = vmul.f32 0.45186275, %v389_v54  ;;  %v582_v47 = vmul.f32 0.27406862, %v534_v57  ;;  %v438_v3 = vmul.f32 0.45186275, %v532_v33 }
  0x8d   : > { %v1112_v5 = vadd.f32 %v1035_v60, %v903_v31  ;;  %v827_v48 = vrot.slane %v707_v63, 1  ;;  %v1036_v6 = vrot.slane %v924_v62, 2  ;;  %v664_v38 = vmul.f32 0.27406862, %v628_v36  ;;  %v539_v57 = vld [vmem:[#allocation2 + $0x188] sm:$0xff] }
  0x8e   : > { %v665_v8 = vmul.f32 0.27406862, %v629_v42  ;;  %v708_v9 = vmul.f32 0.45186275, %v628_v36  ;;  %v709_v55 = vmul.f32 0.45186275, %v629_v42  ;;  %v485_v58 = vadd.f32 %v437_v0, %v341_v61 }
  0x8f   : > { %1144 = vst.msk [vmem:[%s1462_s16 + $0xb0] sm:$0xff] %vm148_vm0, %v1112_v5  ;;  %v828_v10 = vsel %vm768_vm3, %v825_v24, %v827_v48  ;;  %v1037_v56 = vsel %vm977_vm4, %v1034_v50, %v1036_v6  ;;  %v1038_v12 = vrot.slane %v664_v38, 2  ;;  %v439_v13 = vmul.f32 0.45186275, %v533_v45  ;;  %v538_v45 = vld [vmem:[#allocation2 + $0x180] sm:$0xff] }
  0x90   : > { %v904_v17 = vadd.f32 %v828_v10, %v663_v21  ;;  %v829_v18 = vrot.slane %v708_v9, 1  ;;  %v830_v19 = vrot.slane %v709_v55, 1  ;;  %v1039_v22 = vrot.slane %v665_v8, 2  ;;  %v395_v62 = vld [vmem:[#allocation2 + $0x178] sm:$0x3] }
  0x91   : > { %v630_v4 = vadd.f32 %v582_v47, %v485_v58  ;;  %v486_v2 = vadd.f32 %v1614_v15, %v438_v3  ;;  %v487_v23 = vadd.f32 %v1619_v20, %v439_v13  ;;  %v1647_v26 = vmul.f32 0.27406862, %v535_v7  ;;  %v540_v3 = vld [vmem:[#allocation2 + $0x190] sm:$0x3] }
  0x92   : > { %v1113_v30 = vadd.f32 %v1037_v56, %v904_v17  ;;  %v831_v32 = vsel %vm768_vm3, %v829_v18, %v830_v19  ;;  %v1040_v49 = vsel %vm977_vm4, %v1038_v12, %v1039_v22  ;;  %v1651_v25 = vmul.f32 0.27406862, %v536_v14 }
  0x93   : > { %v905_v33 = vadd.f32 %v831_v32, %v664_v38  ;;  %v710_v35 = vmul.f32 0.45186275, %v630_v4  ;;  %v925_v16 = vmul.f32 0.27406862, %v630_v4  ;;  %v631_v21 = vadd.f32 %v1647_v26, %v486_v2 }
  0x94   : > { %1145 = vst.msk [vmem:[%s1462_s16 + $0xb8] sm:$0xff] %vm148_vm0, %v1113_v30  ;;  %v632_v15 = vadd.f32 %v1651_v25, %v487_v23  ;;  %v344_v20 = vmul.f32 0.27406862, %v296_v1  ;;  %v440_v11 = vmul.f32 0.45186275, %v392_v28  ;;  %v541_v28 = vld [vmem:[#allocation2 + $0x198] sm:$0xff] }
  0x95   : > { %v585_v37 = vmul.f32 0.27406862, %v537_v29  ;;  %v1114_v39 = vadd.f32 %v1040_v49, %v905_v33  ;;  %v832_v40 = vrot.slane %v710_v35, 1  ;;  %v1041_v41 = vrot.slane %v925_v16, 2  ;;  %v542_v33 = vld [vmem:[#allocation2 + $0x1a0] sm:$0xff] }
  0x96   : > { %v666_v44 = vmul.f32 0.27406862, %v631_v21  ;;  %v667_v43 = vmul.f32 0.27406862, %v632_v15  ;;  %v711_v46 = vmul.f32 0.45186275, %v631_v21  ;;  %v488_v50 = vadd.f32 %v440_v11, %v344_v20 }
  0x97   : > { %v712_v24 = vmul.f32 0.45186275, %v632_v15  ;;  %1146 = vst.msk [vmem:[%s1462_s16 + $0xc0] sm:$0xff] %vm148_vm0, %v1114_v39  ;;  %v833_v51 = vsel %vm768_vm3, %v830_v19, %v832_v40  ;;  %v1042_v27 = vsel %vm977_vm4, %v1039_v22, %v1041_v41  ;;  %v441_v54 = vmul.f32 0.45186275, %v535_v7 }
  0x98   : > { %v1043_v52 = vrot.slane %v666_v44, 2  ;;  %v906_v60 = vadd.f32 %v833_v51, %v665_v8  ;;  %v834_v61 = vrot.slane %v711_v46, 1  ;;  %v1044_v63 = vrot.slane %v667_v43, 2  ;;  %v302_v35 = vld [vmem:[#allocation2 + $0x178] sm:$0x3] }
  0x99   : > { %v835_v31 = vrot.slane %v712_v24, 1  ;;  %v633_v36 = vadd.f32 %v585_v37, %v488_v50  ;;  %v442_v42 = vmul.f32 0.45186275, %v536_v14  ;;  %v489_v0 = vadd.f32 %v1631_v53, %v441_v54  ;;  %v398_v11 = vld [vmem:[#allocation2 + $0x190] sm:$0x3] }
  0x9a   : > { %v586_v47 = vmul.f32 0.27406862, %v538_v45  ;;  %v1115_v5 = vadd.f32 %v1042_v27, %v906_v60  ;;  %v1045_v6 = vsel %vm977_vm4, %v1043_v52, %v1044_v63  ;;  %v587_v38 = vmul.f32 0.27406862, %v539_v57  ;;  %v543_v46 = vld [vmem:[#allocation2 + $0x1a8] sm:$0x3] }
  0x9b   : > { %v836_v48 = vsel %vm768_vm3, %v834_v61, %v835_v31  ;;  %v713_v9 = vmul.f32 0.45186275, %v633_v36  ;;  %v926_v8 = vmul.f32 0.27406862, %v633_v36  ;;  %v490_v55 = vadd.f32 %v1637_v34, %v442_v42 }
  0x9c   : > { %v907_v7 = vadd.f32 %v836_v48, %v666_v44  ;;  %1147 = vst.msk [vmem:[%s1462_s16 + $0xc8] sm:$0xff] %vm148_vm0, %v1115_v5  ;;  %v634_v58 = vadd.f32 %v586_v47, %v489_v0  ;;  %v347_v10 = vmul.f32 0.27406862, %v299_v59  ;;  %v443_v56 = vmul.f32 0.45186275, %v395_v62 }
  0x9d   : > { %v588_v53 = vmul.f32 0.27406862, %v540_v3  ;;  %v837_v13 = vrot.slane %v713_v9, 1  ;;  %v1046_v14 = vrot.slane %v926_v8, 2  ;;  %v635_v17 = vadd.f32 %v587_v38, %v490_v55 }
  0x9e   : > { %v1116_v12 = vadd.f32 %v1045_v6, %v907_v7  ;;  %v668_v18 = vmul.f32 0.27406862, %v634_v58  ;;  %v714_v19 = vmul.f32 0.45186275, %v634_v58  ;;  %v491_v22 = vadd.f32 %v443_v56, %v347_v10 }
  0x9f   : > { %v444_v1 = vmul.f32 0.45186275, %v538_v45  ;;  %v838_v4 = vsel %vm768_vm3, %v835_v31, %v837_v13  ;;  %v1047_v34 = vsel %vm977_vm4, %v1044_v63, %v1046_v14  ;;  %v669_v2 = vmul.f32 0.27406862, %v635_v17 }
  0xa0   : > { %1148 = vst.msk [vmem:[%s1462_s16 + $0xd0] sm:$0xff] %vm148_vm0, %v1116_v12  ;;  %v715_v23 = vmul.f32 0.45186275, %v635_v17  ;;  %v908_v29 = vadd.f32 %v838_v4, %v667_v43  ;;  %v839_v30 = vrot.slane %v714_v19, 1  ;;  %v1048_v32 = vrot.slane %v668_v18, 2 }
  0xa1   : > { %v636_v49 = vadd.f32 %v588_v53, %v491_v22  ;;  %v1049_v21 = vrot.slane %v669_v2, 2  ;;  %v445_v15 = vmul.f32 0.45186275, %v539_v57  ;;  %v492_v20 = vadd.f32 %v1647_v26, %v444_v1 }
  0xa2   : > { %v840_v16 = vrot.slane %v715_v23, 1  ;;  %v1117_v37 = vadd.f32 %v1047_v34, %v908_v29  ;;  %v589_v41 = vmul.f32 0.27406862, %v541_v28  ;;  %v590_v43 = vmul.f32 0.27406862, %v542_v33 }
  0xa3   : > { %v716_v39 = vmul.f32 0.45186275, %v636_v49  ;;  %v927_v40 = vmul.f32 0.27406862, %v636_v49  ;;  %v493_v45 = vadd.f32 %v1651_v25, %v445_v15  ;;  %v1050_v26 = vsel %vm977_vm4, %v1048_v32, %v1049_v21 }
  0xa4   : > { %v841_v44 = vsel %vm768_vm3, %v839_v30, %v840_v16  ;;  %1149 = vst.msk [vmem:[%s1462_s16 + $0xd8] sm:$0xff] %vm148_vm0, %v1117_v37  ;;  %v637_v27 = vadd.f32 %v589_v41, %v492_v20  ;;  %v350_v54 = vmul.f32 0.27406862, %v302_v35  ;;  %v446_v57 = vmul.f32 0.45186275, %v398_v11 }
  0xa5   : > { %v909_v24 = vadd.f32 %v841_v44, %v668_v18  ;;  %v842_v50 = vrot.slane %v716_v39, 1  ;;  %v1051_v51 = vrot.slane %v927_v40, 2  ;;  %v638_v52 = vadd.f32 %v590_v43, %v493_v45 }
  0xa6   : > { %v670_v61 = vmul.f32 0.27406862, %v637_v27  ;;  %v591_v25 = vmul.f32 0.27406862, %v543_v46  ;;  %v717_v62 = vmul.f32 0.45186275, %v637_v27  ;;  %v494_v47 = vadd.f32 %v446_v57, %v350_v54 }
  0xa7   : > { %v1118_v59 = vadd.f32 %v1050_v26, %v909_v24  ;;  %v843_v60 = vsel %vm768_vm3, %v840_v16, %v842_v50  ;;  %v671_v63 = vmul.f32 0.27406862, %v638_v52  ;;  %v718_v36 = vmul.f32 0.45186275, %v638_v52 }
  0xa8   : > { %v910_v31 = vadd.f32 %v843_v60, %v669_v2  ;;  %v1052_v42 = vsel %vm977_vm4, %v1049_v21, %v1051_v51  ;;  %v1053_v0 = vrot.slane %v670_v61, 2  ;;  %v844_v5 = vrot.slane %v717_v62, 1 }
  0xa9   : > { %1150 = vst.msk [vmem:[%s1462_s16 + $0xe0] sm:$0xff] %vm148_vm0, %v1118_v59  ;;  %v845_v48 = vrot.slane %v718_v36, 1  ;;  %v1054_v6 = vrot.slane %v671_v63, 2  ;;  %v639_v38 = vadd.f32 %v591_v25, %v494_v47 }
  0xaa   : > { %v1119_v3 = vadd.f32 %v1052_v42, %v910_v31 }
  0xab   : > { %v846_v7 = vsel %vm768_vm3, %v844_v5, %v845_v48  ;;  %v719_v8 = vmul.f32 0.45186275, %v639_v38  ;;  %v928_v55 = vmul.f32 0.27406862, %v639_v38  ;;  %v1055_v58 = vsel %vm977_vm4, %v1053_v0, %v1054_v6 }
  0xac   : > { %1151 = vst.msk [vmem:[%s1462_s16 + $0xe8] sm:$0xff] %vm148_vm0, %v1119_v3  ;;  %v911_v9 = vadd.f32 %v846_v7, %v670_v61 }
  0xad   : > { %v847_v56 = vrot.slane %v719_v8, 1  ;;  %v1056_v53 = vrot.slane %v928_v55, 2 }
  0xae   : > { %v1120_v10 = vadd.f32 %v1055_v58, %v911_v9 }
  0xaf   : > { %v848_v12 = vsel %vm768_vm3, %v845_v48, %v847_v56  ;;  %v1057_v14 = vsel %vm977_vm4, %v1054_v6, %v1056_v53 }
  0xb0   : > { %1152 = vst.msk [vmem:[%s1462_s16 + $0xf0] sm:$0xff] %vm148_vm0, %v1120_v10  ;;  %v912_v13 = vadd.f32 %v848_v12, %v671_v63 }
  0xb2   : > { %v1121_v17 = vadd.f32 %v1057_v14, %v912_v13 }
  0xb4   : > { %1153 = vst.msk [vmem:[%s1462_s16 + $0xf8] sm:$0xff] %vm148_vm0, %v1121_v17 }
  0xb5 PF: > { %s11_s8 = sadd.s32 1, %s1297_s8   ;;  %s1702_s6 = smov %s1293_s7 }
  0xb6   : > { %p8_p5 = scmp.ge.s32.totalorder %s11_s8, 4   ;;  %s1703_s7 = smov %s1705_s9 }
  0xb8   :  { %10 = sbr.rel (!%p8_p5) target bundleno = 2 (0x2), region = 57 }

</bundles_post_ra>
